<compile_context>
chip_gen: v6e
topology: v6e:2x2x1
jax: 0.10.0
libtpu: 0.0.40
codegen_flags: <defaults>
</compile_context>

<pallas_src>
import functools

import jax
import jax.numpy as jnp
from jax.experimental import pallas as pl
from jax.experimental.pallas import tpu as pltpu


def _round_up(x, m):
    return (x + m - 1) // m * m


# ---- sin/cos with a shared range reduction ----------------------------------
# Cephes-style 3-term Cody-Waite reduction modulo pi/2 (constants sum to pi/2
# and have short mantissas, so q*DP_k is exact for the moderate |x| this op
# produces: |proj| <= 2*pi*|coords|*|embed| ~ O(1e2)). Both the sin and cos
# minimax polynomials are evaluated on the single reduced argument.
_DP1 = 1.5703125
_DP2 = 4.837512969970703125e-4
_DP3 = 7.54978995489188216e-8
_SIN_C = (-1.9515295891e-4, 8.3321608736e-3, -1.6666654611e-1)
_COS_C = (2.443315711809948e-5, -1.388731625493765e-3, 4.166664568298827e-2)


def _sincos(x):
    q = jnp.floor(x * (2.0 / jnp.pi) + 0.5)            # nearest multiple of pi/2
    r = ((x - q * _DP1) - q * _DP2) - q * _DP3          # shared reduced argument
    z = r * r
    sin_r = r + r * z * ((_SIN_C[0] * z + _SIN_C[1]) * z + _SIN_C[2])
    cos_r = 1.0 - 0.5 * z + z * z * ((_COS_C[0] * z + _COS_C[1]) * z + _COS_C[2])
    qi = q.astype(jnp.int32)
    swap = (qi & 1) == 1
    sin_sign = jnp.where((qi & 2) == 2, -1.0, 1.0)
    cos_sign = jnp.where(((qi + 1) & 2) == 2, -1.0, 1.0)
    sin_x = jnp.where(swap, cos_r, sin_r) * sin_sign
    cos_x = jnp.where(swap, sin_r, cos_r) * cos_sign
    return sin_x, cos_x


def _random_fourier_kernel(c_ref, e_ref, o_ref):
    c = c_ref[...]                     # (TM, 2)  coords tile
    e = e_ref[...]                     # (2, E)   weight, already scaled by 2*pi
    # (TM, 2) @ (2, E) with K == 2: two broadcast multiply-adds on the VPU
    # (a real MXU matvec would just force relayouts of near-empty tiles).
    proj = c[:, 0:1] * e[0:1, :] + c[:, 1:2] * e[1:2, :]        # (TM, E)
    sin_p, cos_p = _sincos(proj)                                # shared reduction
    out = jnp.concatenate([c, sin_p, cos_p], axis=-1)           # (TM, 2E+2)
    o_ref[...] = out.astype(o_ref.dtype)


def _pick_block_rows(rows, out_dim, itemsize):
    """Row-tile: ~1 MiB of lane-padded output per tile, >= 8 grid steps when
    rows allow, even grid extent (balanced v7x dual-TC sharding), and a padded
    double-buffered in+out footprint capped at ~40 MiB (v7x VMEM headroom)."""
    lanes_in = 128                               # (tm, 2) pads to 128 lanes in VMEM
    lanes_out = _round_up(out_dim, 128)
    row_bytes_padded = itemsize * (lanes_in + lanes_out)

    tm = (1 << 20) // (itemsize * lanes_out)                 # ~1 MiB padded out slab
    tm = min(tm, (20 << 20) // row_bytes_padded)             # <= ~40 MiB double-buffered
    tm = min(tm, rows)
    tm = max(8, (tm // 8) * 8)

    steps = pl.cdiv(rows, tm)
    want = steps
    if rows >= 64:
        want = max(want, 8)                      # keep the DMA pipeline in steady state
    if want > 1 and want % 2:
        want += 1                                # even extent -> both v7x cores balanced
    if want != steps:
        tm = max(8, _round_up(pl.cdiv(rows, want), 8))
    return tm


@functools.partial(jax.jit, static_argnames=("block_rows", "out_dtype"))
def random_fourier(coords, embed, block_rows=None, out_dtype=None):
    """coords: (B, N, 2); embed: (2, E) -- the module's std_scale-scaled gaussian.

    out_dtype: optionally emit bf16 to halve HBM write traffic (the output is
    ~97% of HBM bytes on this bandwidth-bound op) if the consumer tolerates it.
    """
    B, N, two = coords.shape
    assert two == 2 and embed.shape[0] == 2
    E = embed.shape[1]
    out_dim = 2 * E + 2
    out_dtype = coords.dtype if out_dtype is None else out_dtype

    rows = B * N
    coords_flat = coords.reshape(rows, 2)
    # Fold the 2*pi scale into the tiny (2, E) weight instead of scaling coords.
    embed_2pi = (2.0 * jnp.pi) * embed.astype(coords.dtype)

    in_itemsize = jnp.dtype(coords.dtype).itemsize
    out_itemsize = jnp.dtype(out_dtype).itemsize
    if block_rows is not None:
        tm = max(8, _round_up(block_rows, 8))
    else:
        tm = _pick_block_rows(rows, out_dim, in_itemsize)
    grid = (pl.cdiv(rows, tm),)

    # Lane-padded VMEM footprint: coords tile pads its 2 lanes to 128, the
    # output tile pads out_dim to the next multiple of 128, the (2, E) weight
    # pads to an (8, 128k) block. Double-buffered, plus headroom.
    lanes_in = 128
    lanes_out = _round_up(out_dim, 128)
    tile_bytes = tm * (in_itemsize * lanes_in + out_itemsize * lanes_out)
    embed_bytes = in_itemsize * 8 * _round_up(E, 128)
    vmem_bytes = int(min(40 << 20,
                         max(16 << 20, 2 * (tile_bytes + embed_bytes) + (2 << 20))))

    out_flat = pl.pallas_call(
        _random_fourier_kernel,
        out_shape=jax.ShapeDtypeStruct((rows, out_dim), out_dtype),
        grid_spec=pltpu.PrefetchScalarGridSpec(
            num_scalar_prefetch=0,
            grid=grid,
            in_specs=[
                pl.BlockSpec((tm, 2), lambda i: (i, 0)),
                # Constant index map: the pipeliner keeps the ~4 KiB weight
                # block resident instead of re-fetching it per step.
                pl.BlockSpec((2, E), lambda i: (0, 0)),
            ],
            # Output stays out_dim (66) lanes wide in HBM: padding it to 128
            # would nearly double HBM write bytes on a write-dominated kernel.
            out_specs=pl.BlockSpec((tm, out_dim), lambda i: (i, 0)),
        ),
        compiler_params=pltpu.CompilerParams(
            dimension_semantics=("parallel",),
            vmem_limit_bytes=vmem_bytes,
        ),
    )(coords_flat, embed_2pi)

    return out_flat.reshape(B, N, out_dim)


def random_fourier_ref(coords, embed):
    """Pure-JAX reference mirroring the (intended) PyTorch forward."""
    proj = jnp.matmul(2.0 * jnp.pi * coords, embed)                    # (B, N, E)
    pos = jnp.concatenate([jnp.sin(proj), jnp.cos(proj)], axis=-1)     # (B, N, 2E)
    return jnp.concatenate([coords, pos], axis=-1)                     # (B, N, 2E+2)


if __name__ == "__main__":
    # Small shapes consistent with the module: batch=2, 256 coordinate points,
    # embedding_length=32 -> out_dim = 66.
    B, N, E = 2, 256, 32
    std_scale = 1.0

    key = jax.random.PRNGKey(0)
    kc, ke = jax.random.split(key)
    coords = jax.random.uniform(kc, (B, N, 2), dtype=jnp.float32)
    embed = std_scale * jax.random.normal(ke, (2, E), dtype=jnp.float32)

    out = jax.block_until_ready(random_fourier(coords, embed))
    ref = random_fourier_ref(coords, embed)

    assert out.shape == (B, N, 2 * E + 2)
    assert jnp.allclose(out, ref, atol=1e-3, rtol=1e-3), "mismatch vs JAX reference"

    print("KERNEL_OK")
</pallas_src>

<mosaic_0001>
module attributes {stable_mosaic.version = 11 : i64} {
  func.func @_random_fourier_kernel(%arg0: i32, %arg1: memref<64x2xf32, #tpu.memory_space<vmem>>, %arg2: memref<2x32xf32, #tpu.memory_space<vmem>>, %arg3: memref<64x66xf32, #tpu.memory_space<vmem>>) attributes {dimension_semantics = [#tpu.dimension_semantics<parallel>], iteration_bounds = array<i64: 8>, scalar_prefetch = 0 : i64, scratch_operands = 0 : i64, tpu.core_type = #tpu.core_type<tc>, window_params = [{transform_indices = @transform_0, window_bounds = array<i64: 64, 2>}, {pipeline_mode = #tpu.pipeline_mode<synchronous>, transform_indices = @transform_1, window_bounds = array<i64: 2, 32>}, {transform_indices = @transform_2, window_bounds = array<i64: 64, 66>}]} {
    %c0 = arith.constant 0 : index
    %c0_0 = arith.constant 0 : index
    %0 = vector.load %arg1[%c0, %c0_0] : memref<64x2xf32, #tpu.memory_space<vmem>>, vector<64x2xf32>
    %c0_1 = arith.constant 0 : index
    %c0_2 = arith.constant 0 : index
    %1 = vector.load %arg2[%c0_1, %c0_2] : memref<2x32xf32, #tpu.memory_space<vmem>>, vector<2x32xf32>
    %2 = vector.extract_strided_slice %0 {offsets = [0, 0], sizes = [64, 1], strides = [1, 1]} : vector<64x2xf32> to vector<64x1xf32>
    %3 = vector.extract_strided_slice %1 {offsets = [0, 0], sizes = [1, 32], strides = [1, 1]} : vector<2x32xf32> to vector<1x32xf32>
    %4 = vector.broadcast %2 : vector<64x1xf32> to vector<64x32xf32>
    %5 = vector.broadcast %3 : vector<1x32xf32> to vector<64x32xf32>
    %6 = arith.mulf %4, %5 : vector<64x32xf32>
    %7 = vector.extract_strided_slice %0 {offsets = [0, 1], sizes = [64, 1], strides = [1, 1]} : vector<64x2xf32> to vector<64x1xf32>
    %8 = vector.extract_strided_slice %1 {offsets = [1, 0], sizes = [1, 32], strides = [1, 1]} : vector<2x32xf32> to vector<1x32xf32>
    %9 = vector.broadcast %7 : vector<64x1xf32> to vector<64x32xf32>
    %10 = vector.broadcast %8 : vector<1x32xf32> to vector<64x32xf32>
    %11 = arith.mulf %9, %10 : vector<64x32xf32>
    %12 = arith.addf %6, %11 : vector<64x32xf32>
    %cst = arith.constant 0.636619746 : f32
    %13 = vector.broadcast %cst : f32 to vector<64x32xf32>
    %14 = arith.mulf %12, %13 : vector<64x32xf32>
    %cst_3 = arith.constant 5.000000e-01 : f32
    %15 = vector.broadcast %cst_3 : f32 to vector<64x32xf32>
    %16 = arith.addf %14, %15 : vector<64x32xf32>
    %17 = math.floor %16 : vector<64x32xf32>
    %cst_4 = arith.constant 1.5703125 : f32
    %18 = vector.broadcast %cst_4 : f32 to vector<64x32xf32>
    %19 = arith.mulf %17, %18 : vector<64x32xf32>
    %20 = arith.subf %12, %19 : vector<64x32xf32>
    %cst_5 = arith.constant 4.83751297E-4 : f32
    %21 = vector.broadcast %cst_5 : f32 to vector<64x32xf32>
    %22 = arith.mulf %17, %21 : vector<64x32xf32>
    %23 = arith.subf %20, %22 : vector<64x32xf32>
    %cst_6 = arith.constant 7.549790e-08 : f32
    %24 = vector.broadcast %cst_6 : f32 to vector<64x32xf32>
    %25 = arith.mulf %17, %24 : vector<64x32xf32>
    %26 = arith.subf %23, %25 : vector<64x32xf32>
    %27 = arith.mulf %26, %26 : vector<64x32xf32>
    %28 = arith.mulf %26, %27 : vector<64x32xf32>
    %cst_7 = arith.constant -1.95152956E-4 : f32
    %29 = vector.broadcast %cst_7 : f32 to vector<64x32xf32>
    %30 = arith.mulf %29, %27 : vector<64x32xf32>
    %cst_8 = arith.constant 0.00833216123 : f32
    %31 = vector.broadcast %cst_8 : f32 to vector<64x32xf32>
    %32 = arith.addf %30, %31 : vector<64x32xf32>
    %33 = arith.mulf %32, %27 : vector<64x32xf32>
    %cst_9 = arith.constant -0.166666552 : f32
    %34 = vector.broadcast %cst_9 : f32 to vector<64x32xf32>
    %35 = arith.addf %33, %34 : vector<64x32xf32>
    %36 = arith.mulf %28, %35 : vector<64x32xf32>
    %37 = arith.addf %26, %36 : vector<64x32xf32>
    %cst_10 = arith.constant 5.000000e-01 : f32
    %38 = vector.broadcast %cst_10 : f32 to vector<64x32xf32>
    %39 = arith.mulf %38, %27 : vector<64x32xf32>
    %cst_11 = arith.constant 1.000000e+00 : f32
    %40 = vector.broadcast %cst_11 : f32 to vector<64x32xf32>
    %41 = arith.subf %40, %39 : vector<64x32xf32>
    %42 = arith.mulf %27, %27 : vector<64x32xf32>
    %cst_12 = arith.constant 2.44331568E-5 : f32
    %43 = vector.broadcast %cst_12 : f32 to vector<64x32xf32>
    %44 = arith.mulf %43, %27 : vector<64x32xf32>
    %cst_13 = arith.constant -0.00138873165 : f32
    %45 = vector.broadcast %cst_13 : f32 to vector<64x32xf32>
    %46 = arith.addf %44, %45 : vector<64x32xf32>
    %47 = arith.mulf %46, %27 : vector<64x32xf32>
    %cst_14 = arith.constant 0.0416666456 : f32
    %48 = vector.broadcast %cst_14 : f32 to vector<64x32xf32>
    %49 = arith.addf %47, %48 : vector<64x32xf32>
    %50 = arith.mulf %42, %49 : vector<64x32xf32>
    %51 = arith.addf %41, %50 : vector<64x32xf32>
    %52 = arith.fptosi %17 : vector<64x32xf32> to vector<64x32xi32>
    %c1_i32 = arith.constant 1 : i32
    %53 = vector.broadcast %c1_i32 : i32 to vector<64x32xi32>
    %54 = arith.andi %52, %53 : vector<64x32xi32>
    %c1_i32_15 = arith.constant 1 : i32
    %55 = vector.broadcast %c1_i32_15 : i32 to vector<64x32xi32>
    %56 = arith.cmpi eq, %54, %55 : vector<64x32xi32>
    %c2_i32 = arith.constant 2 : i32
    %57 = vector.broadcast %c2_i32 : i32 to vector<64x32xi32>
    %58 = arith.andi %52, %57 : vector<64x32xi32>
    %c2_i32_16 = arith.constant 2 : i32
    %59 = vector.broadcast %c2_i32_16 : i32 to vector<64x32xi32>
    %60 = arith.cmpi eq, %58, %59 : vector<64x32xi32>
    %cst_17 = arith.constant -1.000000e+00 : f32
    %cst_18 = arith.constant 1.000000e+00 : f32
    %61 = vector.broadcast %cst_17 : f32 to vector<64x32xf32>
    %62 = vector.broadcast %cst_18 : f32 to vector<64x32xf32>
    %63 = arith.select %60, %61, %62 : vector<64x32xi1>, vector<64x32xf32>
    %c1_i32_19 = arith.constant 1 : i32
    %64 = vector.broadcast %c1_i32_19 : i32 to vector<64x32xi32>
    %65 = arith.addi %52, %64 : vector<64x32xi32>
    %c2_i32_20 = arith.constant 2 : i32
    %66 = vector.broadcast %c2_i32_20 : i32 to vector<64x32xi32>
    %67 = arith.andi %65, %66 : vector<64x32xi32>
    %c2_i32_21 = arith.constant 2 : i32
    %68 = vector.broadcast %c2_i32_21 : i32 to vector<64x32xi32>
    %69 = arith.cmpi eq, %67, %68 : vector<64x32xi32>
    %cst_22 = arith.constant -1.000000e+00 : f32
    %cst_23 = arith.constant 1.000000e+00 : f32
    %70 = vector.broadcast %cst_22 : f32 to vector<64x32xf32>
    %71 = vector.broadcast %cst_23 : f32 to vector<64x32xf32>
    %72 = arith.select %69, %70, %71 : vector<64x32xi1>, vector<64x32xf32>
    %73 = arith.select %56, %51, %37 : vector<64x32xi1>, vector<64x32xf32>
    %74 = arith.mulf %73, %63 : vector<64x32xf32>
    %75 = arith.select %56, %37, %51 : vector<64x32xi1>, vector<64x32xf32>
    %76 = arith.mulf %75, %72 : vector<64x32xf32>
    %77 = tpu.concatenate %0, %74, %76 in 1 : vector<64x2xf32>, vector<64x32xf32>, vector<64x32xf32> -> vector<64x66xf32>
    %c0_24 = arith.constant 0 : index
    %c0_25 = arith.constant 0 : index
    %78 = vector.load %arg3[%c0_24, %c0_25] : memref<64x66xf32, #tpu.memory_space<vmem>>, vector<64x66xf32>
    tpu.vector_store %arg3[%c0_24, %c0_25], %77 {strides = array<i32>} : memref<64x66xf32, #tpu.memory_space<vmem>>, vector<64x66xf32>,
    return
  }
  func.func @transform_0(%arg0: i32) -> (i32, i32) {
    %c0_i32 = arith.constant 0 : i32
    %c0_i32_0 = arith.constant 0 : i32
    return %arg0, %c0_i32 : i32, i32
  }
  func.func @transform_1(%arg0: i32) -> (i32, i32) {
    %c0_i32 = arith.constant 0 : i32
    %c0_i32_0 = arith.constant 0 : i32
    %c0_i32_1 = arith.constant 0 : i32
    return %c0_i32, %c0_i32_0 : i32, i32
  }
  func.func @transform_2(%arg0: i32) -> (i32, i32) {
    %c0_i32 = arith.constant 0 : i32
    %c0_i32_0 = arith.constant 0 : i32
    return %arg0, %c0_i32 : i32, i32
  }
}

</mosaic_0001>

<bundles_post_ra>
// kernel: random_fourier.1
= control target key start
LH: loop header
LB: loop body
LE: loop exit
PB: predicated region body
PF: predicated region fallthrough
CT: control target
= control target key end

     0   :  { %s799_s9 = smov 0   ;;  %s1285_s0 = inlined_call_operand.vmem [shape: f32[512,2], index: 0, kind: input, shape index: {}]   ;;  %s1286_s1 = inlined_call_operand.vmem [shape: f32[2,32], index: 1, kind: input, shape index: {}]   ;;  %s1287_s2 = inlined_call_operand.vmem [shape: f32[512,66], index: 2, kind: output, shape index: {}]  }
   0x1 LB: > { %s727_s10 = sadd.s32 4294967295, %s777_s9   ;;  %p731_p0 = scmp.ge.s32.totalorder %s777_s9, 1  ;;  %s777_s9 = sphi %s799_s9, %s12_s9  }
   0x2   : > { %p113_p1 = scmp.lt.s32.totalorder %s777_s9, 9 }
   0x4   : > { %p114_p2 = pnand %p731_p0, %p113_p1 }
   0x5   : > { %s732_s11 = sshll.u32 (!%p114_p2), %s727_s10, 3  ;;  %s782_s18 = smov (!%p114_p2), 2  }
   0x6   : > { %117 = sbr.rel (%p114_p2) target bundleno = 374 (0x176), region = 28  ;;  %p136_p3 = scmp.lt.s32.totalorder (!%p114_p2), %s732_s11, 63 }
   0x7   : > { %s783_s19 = smov (!%p114_p2), 34  }
   0xb   : > { %v779_v0 = vmov 0   ;;  %s1305_s11 = smov (!%p136_p3, %s732_s11), 63  ;;  %v780_v9 = vmov 1   ;;  %v196_v12 = vlaneseq  ;;  %v155_v20 = vld [vmem:[%s1286_s1] sm:$0x3] }
   0xc   : > { %768 = vset.pattern.permute.xlu1 %v779_v0  ;;  %767 = vset.pattern.permute.xlu0 %v779_v0  ;;  %s733_s12 = sshll.u32 %s1305_s11, 3 }
   0xd   : > { %s139_s15 = scalar_lea.vmem %s1285_s0, %s733_s12  ;;  %v197_v15 = vshrl.u32 %v196_v12, 7  ;;  %s1240_s22 = scalar_lea.vmem %s1287_s2, %s733_s12 }
   0xe   : > { %v815_v1 = vld [vmem:[%s139_s15 + $0x10] sm:$0xff]  ;;  %v817_v2 = vld [vmem:[%s139_s15] sm:$0xff]  ;;  %v821_v3 = vld [vmem:[%s139_s15 + $0x18] sm:$0xff] }
   0xf   : > { %168 = vperm.xlu1 %768, %v815_v1   ;;  %158 = vperm.xlu0 %767, %v817_v2   ;;  %v823_v4 = vld [vmem:[%s139_s15 + $0x8] sm:$0xff]  ;;  %v829_v6 = vld [vmem:[%s139_s15 + $0x20] sm:$0xff]  ;;  %v833_v7 = vld [vmem:[%s139_s15 + $0x38] sm:$0xff]  ;;  %v198_v18 = vsub.s32 0, %v197_v15  ;;  %v242_v19 = vsub.s32 1, %v197_v15 }
  0x10   : > { %v827_v5 = vld [vmem:[%s139_s15 + $0x28] sm:$0xff]  ;;  %v835_v8 = vld [vmem:[%s139_s15 + $0x30] sm:$0xff] }
  0x11   : > { %v199_v23 = vrot.slane %v155_v20, %v198_v18  ;;  %v243_v24 = vrot.slane %v155_v20, %v242_v19 }
  0x13   : > { %173 = vperm.xlu1 %768, %v821_v3   ;;  %163 = vperm.xlu0 %767, %v823_v4  }
  0x17   : > { %183 = vperm.xlu1 %768, %v827_v5   ;;  %178 = vperm.xlu0 %767, %v829_v6  }
  0x1b   : > { %193 = vperm.xlu1 %768, %v833_v7   ;;  %188 = vperm.xlu0 %767, %v835_v8  }
  0x1f   : > { %770 = vset.pattern.permute.xlu1 %v780_v9  ;;  %769 = vset.pattern.permute.xlu0 %v780_v9 }
  0x20   : > { %213 = vperm.xlu1 %770, %v823_v4   ;;  %209 = vperm.xlu0 %769, %v817_v2  }
  0x24   : > { %217 = vperm.xlu1 %770, %v815_v1   ;;  %221 = vperm.xlu0 %769, %v821_v3  }
  0x28   : > { %225 = vperm.xlu1 %770, %v829_v6   ;;  %229 = vperm.xlu0 %769, %v827_v5  }
  0x2c   : > { %233 = vperm.xlu1 %770, %v835_v8   ;;  %237 = vperm.xlu0 %769, %v833_v7  }
  0x8a   : > { %v169_v10 = vpop.permute.xlu1 %168  ;;  %v159_v11 = vpop.permute.xlu0 %158 }
  0x8b   : > { %v200_v27 = vmul.f32 %v199_v23, %v159_v11  ;;  %v202_v33 = vmul.f32 %v199_v23, %v169_v10 }
  0x8e   : > { %v174_v13 = vpop.permute.xlu1 %173  ;;  %v164_v14 = vpop.permute.xlu0 %163 }
  0x8f   : > { %v201_v28 = vmul.f32 %v199_v23, %v164_v14  ;;  %v203_v34 = vmul.f32 %v199_v23, %v174_v13 }
  0x92   : > { %v184_v16 = vpop.permute.xlu1 %183  ;;  %v179_v17 = vpop.permute.xlu0 %178 }
  0x93   : > { %v205_v45 = vmul.f32 %v199_v23, %v184_v16  ;;  %v204_v52 = vmul.f32 %v199_v23, %v179_v17 }
  0x96   : > { %v194_v21 = vpop.permute.xlu1 %193  ;;  %v189_v22 = vpop.permute.xlu0 %188 }
  0x97   : > { %v207_v53 = vmul.f32 %v199_v23, %v194_v21 }
  0x9b   : > { %v214_v25 = vpop.permute.xlu1 %213  ;;  %v210_v26 = vpop.permute.xlu0 %209 }
  0x9c   : > { %v245_v29 = vmul.f32 %v243_v24, %v214_v25  ;;  %v244_v30 = vmul.f32 %v243_v24, %v210_v26  ;;  %v206_v25 = vmul.f32 %v199_v23, %v189_v22 }
  0x9e   : > { %v253_v31 = vadd.f32 %v245_v29, %v201_v28  ;;  %v252_v32 = vadd.f32 %v244_v30, %v200_v27 }
  0x9f   : > { %v218_v35 = vpop.permute.xlu1 %217  ;;  %v222_v36 = vpop.permute.xlu0 %221 }
  0xa0   : > { %v261_v37 = vmul.f32 0.63661975, %v253_v31  ;;  %v260_v38 = vmul.f32 0.63661975, %v252_v32  ;;  %v246_v39 = vmul.f32 %v243_v24, %v218_v35  ;;  %v247_v40 = vmul.f32 %v243_v24, %v222_v36 }
  0xa2   : > { %v269_v41 = vadd.f32 0.5, %v261_v37  ;;  %v268_v42 = vadd.f32 0.5, %v260_v38  ;;  %v254_v43 = vadd.f32 %v246_v39, %v202_v33  ;;  %v255_v44 = vadd.f32 %v247_v40, %v203_v34 }
  0xa3   : > { %v226_v46 = vpop.permute.xlu1 %225  ;;  %v230_v47 = vpop.permute.xlu0 %229 }
  0xa4   : > { %v850_v48 = vfloor.f32 %v269_v41  ;;  %v852_v49 = vfloor.f32 %v268_v42  ;;  %v262_v50 = vmul.f32 0.63661975, %v254_v43  ;;  %v263_v51 = vmul.f32 0.63661975, %v255_v44 }
  0xa5   : > { %v248_v54 = vmul.f32 %v243_v24, %v226_v46  ;;  %v249_v55 = vmul.f32 %v243_v24, %v230_v47 }
  0xa6   : > { %v285_v56 = vmul.f32 1.5703125, %v850_v48  ;;  %v301_v57 = vmul.f32 0.0004837513, %v850_v48  ;;  %v317_v58 = vmul.f32 7.54979e-08, %v850_v48  ;;  %v284_v59 = vmul.f32 1.5703125, %v852_v49 }
  0xa7   : > { %v300_v60 = vmul.f32 0.0004837513, %v852_v49  ;;  %v316_v61 = vmul.f32 7.54979e-08, %v852_v49  ;;  %v270_v62 = vadd.f32 0.5, %v262_v50  ;;  %v271_v63 = vadd.f32 0.5, %v263_v51  ;;  %v234_v0 = vpop.permute.xlu1 %233  ;;  %v238_v9 = vpop.permute.xlu0 %237 }
  0xa8   : > { %v293_v10 = vsub.f32 %v253_v31, %v285_v56  ;;  %v292_v11 = vsub.f32 %v252_v32, %v284_v59  ;;  %v256_v12 = vadd.f32 %v248_v54, %v204_v52  ;;  %v257_v13 = vadd.f32 %v249_v55, %v205_v45 }
  0xa9   : > { %v860_v14 = vfloor.f32 %v270_v62  ;;  %v862_v15 = vfloor.f32 %v271_v63  ;;  %v250_v16 = vmul.f32 %v243_v24, %v234_v0  ;;  %v251_v17 = vmul.f32 %v243_v24, %v238_v9 }
  0xaa   : > { %v309_v18 = vsub.f32 %v293_v10, %v301_v57  ;;  %v308_v19 = vsub.f32 %v292_v11, %v300_v60  ;;  %v264_v20 = vmul.f32 0.63661975, %v256_v12  ;;  %v265_v21 = vmul.f32 0.63661975, %v257_v13 }
  0xab   : > { %v286_v26 = vmul.f32 1.5703125, %v860_v14  ;;  %v302_v27 = vmul.f32 0.0004837513, %v860_v14  ;;  %v287_v28 = vmul.f32 1.5703125, %v862_v15  ;;  %v318_v31 = vmul.f32 7.54979e-08, %v860_v14 }
  0xac   : > { %v867_v29 = vsub.f32 %v309_v18, %v317_v58  ;;  %v869_v30 = vsub.f32 %v308_v19, %v316_v61  ;;  %v303_v32 = vmul.f32 0.0004837513, %v862_v15  ;;  %v272_v34 = vadd.f32 0.5, %v264_v20 }
  0xad   : > { %v294_v24 = vsub.f32 %v254_v43, %v286_v26  ;;  %v295_v33 = vsub.f32 %v255_v44, %v287_v28  ;;  %v273_v35 = vadd.f32 0.5, %v265_v21  ;;  %v319_v23 = vmul.f32 7.54979e-08, %v862_v15 }
  0xae   : > { %v875_v22 = vmul.f32 %v867_v29, %v867_v29  ;;  %v258_v36 = vadd.f32 %v250_v16, %v206_v25  ;;  %v259_v37 = vadd.f32 %v251_v17, %v207_v53  ;;  %v878_v40 = vfloor.f32 %v272_v34 }
  0xaf   : > { %v310_v38 = vsub.f32 %v294_v24, %v302_v27  ;;  %v311_v39 = vsub.f32 %v295_v33, %v303_v32  ;;  %v880_v41 = vfloor.f32 %v273_v35  ;;  %v884_v43 = vmul.f32 %v869_v30, %v869_v30 }
  0xb0   : > { %v266_v42 = vmul.f32 0.63661975, %v258_v36  ;;  %v267_v45 = vmul.f32 0.63661975, %v259_v37  ;;  %v288_v47 = vmul.f32 1.5703125, %v878_v40  ;;  %v341_v50 = vmul.f32 %v875_v22, %v867_v29 }
  0xb1   : > { %v886_v44 = vsub.f32 %v310_v38, %v318_v31  ;;  %v888_v46 = vsub.f32 %v311_v39, %v319_v23  ;;  %v304_v51 = vmul.f32 0.0004837513, %v878_v40  ;;  %v289_v52 = vmul.f32 1.5703125, %v880_v41 }
  0xb2   : > { %v296_v54 = vsub.f32 %v256_v12, %v288_v47  ;;  %v305_v55 = vmul.f32 0.0004837513, %v880_v41  ;;  %v274_v56 = vadd.f32 0.5, %v266_v42  ;;  %v275_v59 = vadd.f32 0.5, %v267_v45 }
  0xb3   : > { %v897_v53 = vmul.f32 %v886_v44, %v886_v44  ;;  %v902_v57 = vmul.f32 %v888_v46, %v888_v46  ;;  %v297_v58 = vsub.f32 %v257_v13, %v289_v52  ;;  %v349_v60 = vmul.f32 -0.00019515296, %v875_v22 }
  0xb4   : > { %v907_v61 = vmul.f32 %v884_v43, %v869_v30  ;;  %v312_v62 = vsub.f32 %v296_v54, %v304_v51  ;;  %v320_v63 = vmul.f32 7.54979e-08, %v878_v40  ;;  %v910_v0 = vfloor.f32 %v274_v56 }
  0xb5   : > { %v313_v9 = vsub.f32 %v297_v58, %v305_v55  ;;  %v321_v10 = vmul.f32 7.54979e-08, %v880_v41  ;;  %v913_v11 = vfloor.f32 %v275_v59  ;;  %v357_v12 = vadd.f32 0.008332161, %v349_v60 }
  0xb6   : > { %v917_v13 = vmul.f32 %v897_v53, %v886_v44  ;;  %v919_v16 = vsub.f32 %v312_v62, %v320_v63  ;;  %v290_v17 = vmul.f32 1.5703125, %v910_v0  ;;  %v397_v18 = vmul.f32 0.5, %v875_v22 }
  0xb7   : > { %v925_v19 = vmul.f32 %v902_v57, %v888_v46  ;;  %v927_v20 = vsub.f32 %v313_v9, %v321_v10  ;;  %v306_v21 = vmul.f32 0.0004837513, %v910_v0  ;;  %v291_v25 = vmul.f32 1.5703125, %v913_v11 }
  0xb8   : > { %v298_v26 = vsub.f32 %v258_v36, %v290_v17  ;;  %v322_v27 = vmul.f32 7.54979e-08, %v910_v0  ;;  %v307_v28 = vmul.f32 0.0004837513, %v913_v11  ;;  %v365_v31 = vmul.f32 %v357_v12, %v875_v22 }
  0xb9   : > { %v299_v32 = vsub.f32 %v259_v37, %v291_v25  ;;  %v323_v24 = vmul.f32 7.54979e-08, %v913_v11  ;;  %v421_v33 = vmul.f32 2.4433157e-05, %v875_v22  ;;  %v740_v34 = vtrunc.f32 %v850_v48 }
  0xba   : > { %v939_v35 = vmul.f32 %v919_v16, %v919_v16  ;;  %v314_v23 = vsub.f32 %v298_v26, %v306_v21  ;;  %v373_v38 = vadd.f32 -0.16666655, %v365_v31  ;;  %v348_v36 = vmul.f32 -0.00019515296, %v884_v43 }
  0xbb   : > { %v944_v39 = vmul.f32 %v927_v20, %v927_v20  ;;  %v315_v42 = vsub.f32 %v299_v32, %v307_v28  ;;  %v429_v37 = vadd.f32 -0.0013887316, %v421_v33  ;;  %v946_v45 = vcvt.f32.s32 %v740_v34 }
  0xbc   : > { %v948_v47 = vsub.f32 %v314_v23, %v322_v27  ;;  %v381_v51 = vmul.f32 %v373_v38, %v341_v50  ;;  %v356_v48 = vadd.f32 0.008332161, %v348_v36  ;;  %v396_v52 = vmul.f32 0.5, %v884_v43 }
  0xbd   : > { %v951_v54 = vsub.f32 %v315_v42, %v323_v24  ;;  %v437_v55 = vmul.f32 %v429_v37, %v875_v22  ;;  %v477_v56 = vand.u32 1, %v946_v45  ;;  %v493_v58 = vand.u32 2, %v946_v45 }
  0xbe   : > { %v958_v59 = vmul.f32 %v948_v47, %v948_v47  ;;  %v405_v60 = vsub.f32 1.0, %v397_v18  ;;  %v413_v62 = vmul.f32 %v875_v22, %v875_v22  ;;  %v364_v50 = vmul.f32 %v356_v48, %v884_v43 }
  0xbf   : > { %v965_v63 = vmul.f32 %v939_v35, %v919_v16  ;;  %v969_v9 = vmul.f32 %v944_v39, %v927_v20  ;;  %v445_v10 = vadd.f32 0.041666646, %v437_v55  ;;  %vm501_vm0 = vcmp.eq.s32.totalorder %v493_v58, 2 }
  0xc0   : > { %v973_v12 = vmul.f32 %v951_v54, %v951_v54  ;;  %v976_v17 = vadd.f32 %v381_v51, %v867_v29  ;;  %v372_v22 = vadd.f32 -0.16666655, %v364_v50  ;;  %v404_v18 = vsub.f32 1.0, %v396_v52 }
  0xc1   : > { %v453_v21 = vmul.f32 %v445_v10, %v413_v62  ;;  %vm978_vm1 = vcmp.eq.s32.totalorder %v477_v56, 1  ;;  %v420_v26 = vmul.f32 2.4433157e-05, %v884_v43  ;;  %v738_v27 = vtrunc.f32 %v852_v49 }
  0xc2   : > { %v986_v28 = vmul.f32 %v958_v59, %v948_v47  ;;  %v781_v31 = vmov 1.0   ;;  %v412_v29 = vmul.f32 %v884_v43, %v884_v43  ;;  %v350_v24 = vmul.f32 -0.00019515296, %v897_v53 }
  0xc3   : > { %v509_v32 = vsel %vm501_vm0, -1.0, %v781_v31  ;;  %v992_v33 = vadd.f32 %v453_v21, %v405_v60  ;;  %v428_v34 = vadd.f32 -0.0013887316, %v420_v26  ;;  %v994_v23 = vcvt.f32.s32 %v738_v27 }
  0xc4   : > { %v422_v38 = vmul.f32 2.4433157e-05, %v897_v53  ;;  %v380_v49 = vmul.f32 %v372_v22, %v907_v61  ;;  %v358_v36 = vadd.f32 0.008332161, %v350_v24  ;;  %v398_v42 = vmul.f32 0.5, %v897_v53 }
  0xc5   : > { %v742_v37 = vtrunc.f32 %v860_v14  ;;  %v549_v51 = vsel %vm978_vm1, %v992_v33, %v976_v17  ;;  %v436_v48 = vmul.f32 %v428_v34, %v884_v43  ;;  %v476_v52 = vand.u32 1, %v994_v23 }
  0xc6   : > { %v492_v55 = vand.u32 2, %v994_v23  ;;  %v557_v56 = vmul.f32 %v549_v51, %v509_v32  ;;  %v366_v58 = vmul.f32 %v358_v36, %v897_v53  ;;  %v430_v61 = vadd.f32 -0.0013887316, %v422_v38 }
  0xc7   : > { %v1008_v60 = vcvt.f32.s32 %v742_v37  ;;  %v444_v62 = vadd.f32 0.041666646, %v436_v48  ;;  %v414_v14 = vmul.f32 %v897_v53, %v897_v53  ;;  %v351_v50 = vmul.f32 -0.00019515296, %v902_v57 }
  0xc8   : > { %vm500_vm2 = vcmp.eq.s32.totalorder %v492_v55, 2  ;;  %590 = vrot.lane.b32.xlu0 %v557_v56, %s782_s18  ;;  %v1015_v43 = vadd.f32 %v380_v49, %v869_v30  ;;  %v374_v10 = vadd.f32 -0.16666655, %v366_v58  ;;  %v438_v22 = vmul.f32 %v430_v61, %v897_v53 }
  0xc9   : > { %v478_v21 = vand.u32 1, %v1008_v60  ;;  %v452_v26 = vmul.f32 %v444_v62, %v412_v29  ;;  %v406_v27 = vsub.f32 1.0, %v398_v42  ;;  %v494_v32 = vand.u32 2, %v1008_v60 }
  0xca   : > { %v359_v24 = vadd.f32 0.008332161, %v351_v50  ;;  %vm1020_vm3 = vcmp.eq.s32.totalorder %v476_v52, 1  ;;  %v508_v38 = vsel %vm500_vm2, -1.0, %v781_v31  ;;  %v382_v36 = vmul.f32 %v374_v10, %v917_v13 }
  0xcb   : > { %v446_v30 = vadd.f32 0.041666646, %v438_v22  ;;  %v1026_v49 = vadd.f32 %v452_v26, %v404_v18  ;;  %vm1028_vm4 = vcmp.eq.s32.totalorder %v478_v21, 1  ;;  %v399_v42 = vmul.f32 0.5, %v902_v57 }
  0xcc   : > { %v367_v29 = vmul.f32 %v359_v24, %v902_v57  ;;  %v1035_v37 = vadd.f32 %v382_v36, %v886_v44  ;;  %vm502_vm5 = vcmp.eq.s32.totalorder %v494_v32, 2  ;;  %v423_v48 = vmul.f32 2.4433157e-05, %v902_v57 }
  0xcd   : > { %v454_v51 = vmul.f32 %v446_v30, %v414_v14  ;;  %v548_v13 = vsel %vm1020_vm3, %v1026_v49, %v1015_v43  ;;  %v744_v52 = vtrunc.f32 %v862_v15  ;;  %v352_v55 = vmul.f32 -0.00019515296, %v939_v35 }
  0xce   : > { %v375_v18 = vadd.f32 -0.16666655, %v367_v29  ;;  %v556_v56 = vmul.f32 %v548_v13, %v508_v38  ;;  %v415_v44 = vmul.f32 %v902_v57, %v902_v57  ;;  %v431_v61 = vadd.f32 -0.0013887316, %v423_v48 }
  0xcf   : > { %v1044_v58 = vadd.f32 %v454_v51, %v406_v27  ;;  %v510_v62 = vsel %vm502_vm5, -1.0, %v781_v31  ;;  %v1049_v14 = vcvt.f32.s32 %v744_v52  ;;  %v360_v50 = vadd.f32 0.008332161, %v352_v55 }
  0xd0   : > { %v400_v10 = vmul.f32 0.5, %v939_v35  ;;  %588 = vrot.lane.b32.xlu1 %v556_v56, %s782_s18  ;;  %v383_v22 = vmul.f32 %v375_v18, %v925_v19  ;;  %v439_v21 = vmul.f32 %v431_v61, %v902_v57  ;;  %v424_v26 = vmul.f32 2.4433157e-05, %v939_v35 }
  0xd1   : > { %v550_v15 = vsel %vm1028_vm4, %v1044_v58, %v1035_v37  ;;  %v407_v32 = vsub.f32 1.0, %v399_v42  ;;  %v479_v24 = vand.u32 1, %v1049_v14  ;;  %v495_v38 = vand.u32 2, %v1049_v14 }
  0xd2   : > { %v558_v27 = vmul.f32 %v550_v15, %v510_v62  ;;  %v447_v36 = vadd.f32 0.041666646, %v439_v21  ;;  %v368_v30 = vmul.f32 %v360_v50, %v939_v35  ;;  %v432_v29 = vadd.f32 -0.0013887316, %v424_v26 }
  0xd3   : > { %v746_v51 = vtrunc.f32 %v878_v40  ;;  %vm503_vm6 = vcmp.eq.s32.totalorder %v495_v38, 2  ;;  %v408_v48 = vsub.f32 1.0, %v400_v10  ;;  %v416_v19 = vmul.f32 %v939_v35, %v939_v35 }
  0xd4   : > { %v353_v57 = vmul.f32 -0.00019515296, %v944_v39  ;;  %592 = vrot.lane.b32.xlu1 %v558_v27, %s782_s18  ;;  %v1069_v42 = vadd.f32 %v383_v22, %v888_v46  ;;  %v455_v13 = vmul.f32 %v447_v36, %v415_v44  ;;  %v376_v18 = vadd.f32 -0.16666655, %v368_v30 }
  0xd5   : > { %v440_v52 = vmul.f32 %v432_v29, %v939_v35  ;;  %vm1072_vm7 = vcmp.eq.s32.totalorder %v479_v24, 1  ;;  %v511_v40 = vsel %vm503_vm6, -1.0, %v781_v31  ;;  %v1077_v56 = vcvt.f32.s32 %v746_v51 }
  0xd6   : > { %v361_v61 = vadd.f32 0.008332161, %v353_v57  ;;  %v1079_v62 = vadd.f32 %v455_v13, %v407_v32  ;;  %v384_v50 = vmul.f32 %v376_v18, %v965_v63  ;;  %v425_v46 = vmul.f32 2.4433157e-05, %v944_v39 }
  0xd7   : > { %v448_v10 = vadd.f32 0.041666646, %v440_v52  ;;  %v480_v44 = vand.u32 1, %v1077_v56  ;;  %v496_v35 = vand.u32 2, %v1077_v56  ;;  %v748_v22 = vtrunc.f32 %v880_v41 }
  0xd8   : > { %v369_v15 = vmul.f32 %v361_v61, %v944_v39  ;;  %v551_v21 = vsel %vm1072_vm7, %v1079_v62, %v1069_v42  ;;  %v1092_v26 = vadd.f32 %v384_v50, %v919_v16  ;;  %v433_v27 = vadd.f32 -0.0013887316, %v425_v46 }
  0xd9   : > { %v456_v63 = vmul.f32 %v448_v10, %v416_v19  ;;  %v559_v32 = vmul.f32 %v551_v21, %v511_v40  ;;  %vm504_vm8 = vcmp.eq.s32.totalorder %v496_v35, 2  ;;  %v401_v38 = vmul.f32 0.5, %v944_v39 }
  0xda   : > { %v377_v24 = vadd.f32 -0.16666655, %v369_v15  ;;  %v417_v41 = vmul.f32 %v944_v39, %v944_v39  ;;  %v441_v30 = vmul.f32 %v433_v27, %v944_v39  ;;  %v1100_v29 = vcvt.f32.s32 %v748_v22 }
  0xdb   : > { %v1095_v36 = vadd.f32 %v456_v63, %v408_v48  ;;  %594 = vrot.lane.b32.xlu0 %v559_v32, %s782_s18  ;;  %vm1103_vm9 = vcmp.eq.s32.totalorder %v480_v44, 1  ;;  %v512_v51 = vsel %vm504_vm8, -1.0, %v781_v31  ;;  %v354_v48 = vmul.f32 -0.00019515296, %v958_v59 }
  0xdc   : > { %v385_v19 = vmul.f32 %v377_v24, %v969_v9  ;;  %v449_v39 = vadd.f32 0.041666646, %v441_v30  ;;  %v481_v13 = vand.u32 1, %v1100_v29  ;;  %v497_v18 = vand.u32 2, %v1100_v29 }
  0xdd   : > { %v552_v57 = vsel %vm1103_vm9, %v1095_v36, %v1092_v26  ;;  %v347_v52 = vmul.f32 %v973_v12, %v951_v54  ;;  %v409_v61 = vsub.f32 1.0, %v401_v38  ;;  %v362_v50 = vadd.f32 0.008332161, %v354_v48 }
  0xde   : > { %v560_v40 = vmul.f32 %v552_v57, %v512_v51  ;;  %v1119_v9 = vadd.f32 %v385_v19, %v927_v20  ;;  %v457_v10 = vmul.f32 %v449_v39, %v417_v41  ;;  %v402_v46 = vmul.f32 0.5, %v958_v59 }
  0xdf   : > { %v426_v44 = vmul.f32 2.4433157e-05, %v958_v59  ;;  %vm505_vm10 = vcmp.eq.s32.totalorder %v497_v18, 2  ;;  %v370_v35 = vmul.f32 %v362_v50, %v958_v59  ;;  %v750_v15 = vtrunc.f32 %v910_v0 }
  0xe0   : > { %596 = vrot.lane.b32.xlu1 %v560_v40, %s782_s18  ;;  %v355_v22 = vmul.f32 -0.00019515296, %v973_v12  ;;  %v1127_v21 = vadd.f32 %v457_v10, %v409_v61  ;;  %vm1129_vm11 = vcmp.eq.s32.totalorder %v481_v13, 1  ;;  %v418_v20 = vmul.f32 %v958_v59, %v958_v59 }
  0xe1   : > { %v434_v27 = vadd.f32 -0.0013887316, %v426_v44  ;;  %v378_v32 = vadd.f32 -0.16666655, %v370_v35  ;;  %v1135_v24 = vcvt.f32.s32 %v750_v15  ;;  %v427_v41 = vmul.f32 2.4433157e-05, %v973_v12 }
  0xe2   : > { %v363_v38 = vadd.f32 0.008332161, %v355_v22  ;;  %v513_v0 = vsel %vm505_vm10, -1.0, %v781_v31  ;;  %v553_v30 = vsel %vm1129_vm11, %v1127_v21, %v1119_v9  ;;  %v752_v19 = vtrunc.f32 %v913_v11 }
  0xe3   : > { %v442_v51 = vmul.f32 %v434_v27, %v958_v59  ;;  %v561_v48 = vmul.f32 %v553_v30, %v513_v0  ;;  %v386_v57 = vmul.f32 %v378_v32, %v986_v28  ;;  %v410_v39 = vsub.f32 1.0, %v402_v46 }
  0xe4   : > { %v498_v13 = vand.u32 2, %v1135_v24  ;;  %v371_v40 = vmul.f32 %v363_v38, %v973_v12  ;;  %v435_v61 = vadd.f32 -0.0013887316, %v427_v41  ;;  %v753_v50 = vcvt.f32.s32 %v752_v19 }
  0xe5   : > { %v450_v18 = vadd.f32 0.041666646, %v442_v51  ;;  %598 = vrot.lane.b32.xlu0 %v561_v48, %s782_s18  ;;  %v1150_v10 = vadd.f32 %v386_v57, %v948_v47  ;;  %v482_v59 = vand.u32 1, %v1135_v24  ;;  %v403_v11 = vmul.f32 0.5, %v973_v12 }
  0xe6   : > { %v516_v44 = vadd.s32 1, %v994_v23  ;;  %vm506_vm12 = vcmp.eq.s32.totalorder %v498_v13, 2  ;;  %v379_v46 = vadd.f32 -0.16666655, %v371_v40  ;;  %v443_v35 = vmul.f32 %v435_v61, %v973_v12 }
  0xe7   : > { %v458_v28 = vmul.f32 %v450_v18, %v418_v20  ;;  %v419_v15 = vmul.f32 %v973_v12, %v973_v12  ;;  %v483_v22 = vand.u32 1, %v753_v50  ;;  %v499_v27 = vand.u32 2, %v753_v50 }
  0xe8   : > { %v524_v32 = vand.u32 2, %v516_v44  ;;  %v387_v47 = vmul.f32 %v379_v46, %v347_v52  ;;  %v451_v41 = vadd.f32 0.041666646, %v443_v35  ;;  %v517_v0 = vadd.s32 1, %v946_v45 }
  0xe9   : > { %v1158_v38 = vadd.f32 %v458_v28, %v410_v39  ;;  %vm1161_vm13 = vcmp.eq.s32.totalorder %v482_v59, 1  ;;  %v514_v23 = vsel %vm506_vm12, -1.0, %v781_v31  ;;  %v411_v20 = vsub.f32 1.0, %v403_v11 }
  0xea   : > { %vm507_vm14 = vcmp.eq.s32.totalorder %v499_v27, 2  ;;  %v1171_v51 = vadd.f32 %v387_v47, %v951_v54  ;;  %v459_v52 = vmul.f32 %v451_v41, %v419_v15  ;;  %vm532_vm15 = vcmp.eq.s32.totalorder %v524_v32, 2 }
  0xeb   : > { %v554_v12 = vsel %vm1161_vm13, %v1158_v38, %v1150_v10  ;;  %v564_v45 = vsel %vm1020_vm3, %v1015_v43, %v1026_v49  ;;  %v525_v48 = vand.u32 2, %v517_v0  ;;  %v518_v57 = vadd.s32 1, %v1008_v60 }
  0xec   : > { %v562_v19 = vmul.f32 %v554_v12, %v514_v23  ;;  %v467_v39 = vadd.f32 %v459_v52, %v411_v20  ;;  %vm1178_vm0 = vcmp.eq.s32.totalorder %v483_v22, 1  ;;  %v565_v54 = vsel %vm978_vm1, %v976_v17, %v992_v33 }
  0xed   : > { %v519_v18 = vadd.s32 1, %v1049_v14  ;;  %v515_v34 = vsel %vm507_vm14, -1.0, %v781_v31  ;;  %v540_v43 = vsel %vm532_vm15, -1.0, %v781_v31  ;;  %v526_v49 = vand.u32 2, %v518_v57 }
  0xee   : > { %600 = vrot.lane.b32.xlu1 %v562_v19, %s782_s18  ;;  %v520_v60 = vadd.s32 1, %v1077_v56  ;;  %v555_v40 = vsel %vm1178_vm0, %v467_v39, %v1171_v51  ;;  %v572_v61 = vmul.f32 %v564_v45, %v540_v43  ;;  %vm533_vm2 = vcmp.eq.s32.totalorder %v525_v48, 2 }
  0xef   : > { %v527_v59 = vand.u32 2, %v519_v18  ;;  %v563_v25 = vmul.f32 %v555_v40, %v515_v34  ;;  %vm534_vm1 = vcmp.eq.s32.totalorder %v526_v49, 2  ;;  %v566_v17 = vsel %vm1028_vm4, %v1035_v37, %v1044_v58 }
  0xf0   : > { %v528_v33 = vand.u32 2, %v520_v60  ;;  %v521_v14 = vadd.s32 1, %v1100_v29  ;;  %v541_v56 = vsel %vm533_vm2, -1.0, %v781_v31  ;;  %v542_v11 = vsel %vm534_vm1, -1.0, %v781_v31 }
  0xf1   : > { %602 = vrot.lane.b32.xlu0 %v563_v25, %s782_s18  ;;  %v522_v44 = vadd.s32 1, %v1135_v24  ;;  %v573_v28 = vmul.f32 %v565_v54, %v541_v56  ;;  %v574_v46 = vmul.f32 %v566_v17, %v542_v11  ;;  %vm535_vm3 = vcmp.eq.s32.totalorder %v527_v59, 2 }
  0xf2   : > { %620 = vrot.lane.b32.xlu1 %v572_v61, %s783_s19  ;;  %v567_v53 = vsel %vm1072_vm7, %v1069_v42, %v1079_v62  ;;  %vm536_vm4 = vcmp.eq.s32.totalorder %v528_v33, 2  ;;  %v529_v37 = vand.u32 2, %v521_v14  ;;  %v523_v29 = vadd.s32 1, %v753_v50 }
  0xf3   : > { %v530_v58 = vand.u32 2, %v522_v44  ;;  %v568_v35 = vsel %vm1103_vm9, %v1092_v26, %v1095_v36  ;;  %v543_v24 = vsel %vm535_vm3, -1.0, %v781_v31  ;;  %v544_v22 = vsel %vm536_vm4, -1.0, %v781_v31 }
  0xf4   : > { %v575_v15 = vmul.f32 %v567_v53, %v543_v24  ;;  %v576_v55 = vmul.f32 %v568_v35, %v544_v22  ;;  %vm537_vm5 = vcmp.eq.s32.totalorder %v529_v37, 2  ;;  %v531_v42 = vand.u32 2, %v523_v29 }
  0xf5   : > { %622 = vrot.lane.b32.xlu0 %v573_v28, %s783_s19  ;;  %vm538_vm6 = vcmp.eq.s32.totalorder %v530_v58, 2  ;;  %v569_v62 = vsel %vm1129_vm11, %v1119_v9, %v1127_v21  ;;  %v570_v26 = vsel %vm1161_vm13, %v1150_v10, %v1158_v38  ;;  %v545_v36 = vsel %vm537_vm5, -1.0, %v781_v31 }
  0xf6   : > { %624 = vrot.lane.b32.xlu1 %v574_v46, %s783_s19  ;;  %v546_v16 = vsel %vm538_vm6, -1.0, %v781_v31  ;;  %v577_v50 = vmul.f32 %v569_v62, %v545_v36  ;;  %vm539_vm7 = vcmp.eq.s32.totalorder %v531_v42, 2  ;;  %v571_v9 = vsel %vm1178_vm0, %v1171_v51, %v467_v39 }
  0xf7   : > { %v578_v27 = vmul.f32 %v570_v26, %v546_v16  ;;  %v547_v21 = vsel %vm539_vm7, -1.0, %v781_v31  ;;  %vm644_vm8 = vcmask 15360   ;;  %vm653_vm9 = vcmask 277504  }
  0xf8   : > { %v579_v63 = vmul.f32 %v571_v9, %v547_v21  ;;  %vm662_vm10 = vcmask 539648  }
  0xf9   : > { %626 = vrot.lane.b32.xlu0 %v575_v15, %s783_s19 }
  0xfa   : > { %628 = vrot.lane.b32.xlu1 %v576_v55, %s783_s19 }
  0xfd   : > { %630 = vrot.lane.b32.xlu0 %v577_v50, %s783_s19 }
  0xfe   : > { %632 = vrot.lane.b32.xlu1 %v578_v27, %s783_s19 }
 0x101   : > { %634 = vrot.lane.b32.xlu0 %v579_v63, %s783_s19 }
 0x13a   : > { %v591_v32 = vpop.permute.xlu0 %590 }
 0x13b   : > { %v646_v51 = vsel %vm644_vm8, %v823_v4, %v591_v32 }
 0x142   : > { %v589_v10 = vpop.permute.xlu1 %588 }
 0x143   : > { %v645_v31 = vsel %vm644_vm8, %v817_v2, %v589_v10 }
 0x146   : > { %v593_v38 = vpop.permute.xlu1 %592 }
 0x147   : > { %v647_v52 = vsel %vm644_vm8, %v815_v1, %v593_v38 }
 0x14d   : > { %v595_v47 = vpop.permute.xlu0 %594 }
 0x14e   : > { %v648_v57 = vsel %vm644_vm8, %v821_v3, %v595_v47 }
 0x152   : > { %v597_v41 = vpop.permute.xlu1 %596 }
 0x153   : > { %v649_v4 = vsel %vm644_vm8, %v829_v6, %v597_v41 }
 0x157   : > { %v599_v0 = vpop.permute.xlu0 %598 }
 0x158   : > { %v650_v18 = vsel %vm644_vm8, %v827_v5, %v599_v0 }
 0x160   : > { %v601_v30 = vpop.permute.xlu1 %600 }
 0x161   : > { %v651_v3 = vsel %vm644_vm8, %v835_v8, %v601_v30 }
 0x163   : > { %v603_v23 = vpop.permute.xlu0 %602 }
 0x164   : > { %v621_v20 = vpop.permute.xlu1 %620  ;;  %v652_v60 = vsel %vm644_vm8, %v833_v7, %v603_v23 }
 0x165   : > { %v654_v12 = vsel %vm653_vm9, %v645_v31, %v621_v20 }
 0x166   : > { %663 = vst.msk [vmem:[%s1240_s22] sm:$0xff] %vm662_vm10, %v654_v12 }
 0x167   : > { %v623_v19 = vpop.permute.xlu0 %622 }
 0x168   : > { %v625_v45 = vpop.permute.xlu1 %624  ;;  %v655_v48 = vsel %vm653_vm9, %v646_v51, %v623_v19 }
 0x169   : > { %v656_v2 = vsel %vm653_vm9, %v647_v52, %v625_v45  ;;  %664 = vst.msk [vmem:[%s1240_s22 + $0x8] sm:$0xff] %vm662_vm10, %v655_v48 }
 0x16a   : > { %665 = vst.msk [vmem:[%s1240_s22 + $0x10] sm:$0xff] %vm662_vm10, %v656_v2 }
 0x16b   : > { %v627_v39 = vpop.permute.xlu0 %626 }
 0x16c   : > { %v629_v1 = vpop.permute.xlu1 %628  ;;  %v657_v13 = vsel %vm653_vm9, %v648_v57, %v627_v39 }
 0x16d   : > { %v658_v54 = vsel %vm653_vm9, %v649_v4, %v629_v1  ;;  %666 = vst.msk [vmem:[%s1240_s22 + $0x18] sm:$0xff] %vm662_vm10, %v657_v13 }
 0x16e   : > { %667 = vst.msk [vmem:[%s1240_s22 + $0x20] sm:$0xff] %vm662_vm10, %v658_v54 }
 0x16f   : > { %v631_v34 = vpop.permute.xlu0 %630 }
 0x170   : > { %v633_v43 = vpop.permute.xlu1 %632  ;;  %v659_v6 = vsel %vm653_vm9, %v650_v18, %v631_v34 }
 0x171   : > { %v660_v49 = vsel %vm653_vm9, %v651_v3, %v633_v43  ;;  %668 = vst.msk [vmem:[%s1240_s22 + $0x28] sm:$0xff] %vm662_vm10, %v659_v6 }
 0x172   : > { %669 = vst.msk [vmem:[%s1240_s22 + $0x30] sm:$0xff] %vm662_vm10, %v660_v49 }
 0x173   : > { %v635_v40 = vpop.permute.xlu0 %634 }
 0x174   : > { %v661_v61 = vsel %vm653_vm9, %v652_v60, %v635_v40 }
 0x175   : > { %670 = vst.msk [vmem:[%s1240_s22 + $0x38] sm:$0xff] %vm662_vm10, %v661_v61 }
 0x176 PF: > { %s12_s9 = sadd.s32 1, %s777_s9  }
 0x177   : > { %p9_p4 = scmp.ge.s32.totalorder %s12_s9, 10  }
 0x179   :  { %11 = sbr.rel (!%p9_p4) target bundleno = 1 (0x1), region = 58 }

</bundles_post_ra>
